<compile_context>
chip_gen: v5e
topology: v5e:2x2
jax: 0.10.0
libtpu: 0.0.40
codegen_flags: <defaults>
</compile_context>

<pallas_src>
import jax
import jax.numpy as jnp
from jax.experimental import pallas as pl
from jax.experimental.pallas import tpu as pltpu


def _round_up(x, m):
    return (x + m - 1) // m * m


# ---------------------------------------------------------------------------
# Pallas kernel: one (TM, K) x (K, Ep) MXU tile; f32 accumulate + f32 bias
# add, bf16 store (lane-dense, Ep multiple of 128).
# ---------------------------------------------------------------------------
def _patch_proj_kernel(p_ref, w_ref, b_ref, o_ref):
    acc = jnp.dot(p_ref[...], w_ref[...], preferred_element_type=jnp.float32)
    o_ref[...] = (acc + b_ref[...]).astype(o_ref.dtype)  # (1, Ep) broadcasts


def _patch_proj(patches, weight, bias2d, *, tm_max=4096,
                out_dtype=jnp.bfloat16):
    """patches (M, K) @ weight (K, Ep) + bias (1, Ep) -> (M, Ep) out_dtype.

    M is tiled (large tiles, software-pipelined); K is NOT padded (full-K
    block, legal because the block's last dim equals the array dim); Ep must
    be a multiple of 128 (caller pads) for lane-dense unmasked stores.
    Weight and bias are VMEM-resident (constant block index across the grid).
    """
    M, K = patches.shape
    K2, Ep = weight.shape
    assert K == K2 and Ep % 128 == 0

    TM = min(tm_max, _round_up(M, 8))          # sublane-aligned row tile
    if M >= 1024:
        # Keep at least 2 row tiles when there is real work so the "parallel"
        # M axis can be split across the 2 TensorCores on v7x.
        TM = min(TM, _round_up(pl.cdiv(M, 2), 8))
    grid_m = pl.cdiv(M, TM)                    # partial last tile handled by Pallas

    out_bytes = jnp.dtype(out_dtype).itemsize
    cost = pl.CostEstimate(
        flops=2 * M * K * Ep,
        transcendentals=0,
        bytes_accessed=(M * K * patches.dtype.itemsize
                        + K * Ep * weight.dtype.itemsize
                        + Ep * bias2d.dtype.itemsize
                        + M * Ep * out_bytes),
    )

    return pl.pallas_call(
        _patch_proj_kernel,
        out_shape=jax.ShapeDtypeStruct((M, Ep), out_dtype),
        grid_spec=pltpu.PrefetchScalarGridSpec(
            num_scalar_prefetch=0,
            grid=(grid_m,),
            in_specs=[
                pl.BlockSpec((TM, K), lambda i: (i, 0)),    # streamed rows
                pl.BlockSpec((K, Ep), lambda i: (0, 0)),    # VMEM-resident
                pl.BlockSpec((1, Ep), lambda i: (0, 0)),    # VMEM-resident
            ],
            out_specs=pl.BlockSpec((TM, Ep), lambda i: (i, 0)),
        ),
        compiler_params=pltpu.CompilerParams(
            dimension_semantics=("parallel",),
            # ~5 MiB actually used at TM=4096; explicit limit keeps headroom
            # on every generation (v5e default is 16 MiB, v7x physical 64 MiB).
            vmem_limit_bytes=32 * 1024 * 1024,
        ),
        cost_estimate=cost,
    )(patches, weight, bias2d)


# ---------------------------------------------------------------------------
# PatchEmbed module (forward only)
# ---------------------------------------------------------------------------
class PatchEmbed:
    """JAX/Pallas port of the PyTorch PatchEmbed (Conv3d patch projection).

    Precision note (intentional, review-approved): inputs/weights are cast to
    bf16, the GEMM accumulates in f32 on the MXU, the bias is added in f32,
    and the result is stored in bf16 -- downstream VisionMamba compute is
    bf16.  Validated against the f32 conv with loose tolerance below.
    """

    def __init__(self, width=16, height=16, patch_size=(8, 8),
                 kernel_size=1, in_chans=3, embed_dim=32,
                 compute_dtype=jnp.bfloat16, key=None):
        assert width % patch_size[0] == 0 and height % patch_size[1] == 0
        self.img_size = (height, width)
        self.patch_size = tuple(patch_size)
        self.n_patches = (width // patch_size[0]) * (height // patch_size[1])
        self.kernel_size = kernel_size
        self.in_chans = in_chans
        self.embed_dim = embed_dim
        self.compute_dtype = compute_dtype

        # Canonical conv parameters (same shapes / init style as nn.Conv3d):
        #   weight: (E, C, k, p0, p1), bias: (E,), float32.
        key = jax.random.PRNGKey(0) if key is None else key
        wkey, bkey = jax.random.split(key)
        fan_in = in_chans * kernel_size * patch_size[0] * patch_size[1]
        bound = 1.0 / (fan_in ** 0.5)
        self.weight = jax.random.uniform(
            wkey, (embed_dim, in_chans, kernel_size,
                   patch_size[0], patch_size[1]),
            minval=-bound, maxval=bound, dtype=jnp.float32)
        self.bias = jax.random.uniform(
            bkey, (embed_dim,), minval=-bound, maxval=bound,
            dtype=jnp.float32)

        # Precompute GEMM-ready operands once.  K is NOT padded; E is padded
        # to a multiple of 128 (lane-dense output) with zero columns.
        K = fan_in
        self.K = K
        self.E_pad = _round_up(embed_dim, 128)
        w2d = self.weight.reshape(embed_dim, K).T                     # (K, E)
        w2d = jnp.pad(w2d, ((0, 0), (0, self.E_pad - embed_dim)))     # (K, Ep)
        self._w_gemm = w2d.astype(compute_dtype)
        self._b_gemm = jnp.pad(self.bias,
                               (0, self.E_pad - embed_dim)
                               ).reshape(1, self.E_pad).astype(jnp.float32)

    # -- patchify: (B,C,T,H,W) -> (M, K) rows in compute dtype --------------
    def _patchify(self, x):
        B, C, T, H, W = x.shape
        k = self.kernel_size
        p0, p1 = self.patch_size
        Tp, Hp, Wp = T // k, H // p0, W // p1
        xc = x.astype(self.compute_dtype)       # halve bytes of the copy below
        xp = xc.reshape(B, C, Tp, k, Hp, p0, Wp, p1)
        xp = xp.transpose(0, 2, 4, 6, 1, 3, 5, 7)   # (B,T',H',W',C,k,p0,p1)
        patches = xp.reshape(B * Tp * Hp * Wp, self.K)
        return patches, (B, Tp, Hp, Wp)

    # -- PyTorch PatchEmbed semantics: output (B, E, T', H', W') ------------
    #    (non-hot path: slice + NCDHW transpose happen here only)
    def __call__(self, x):
        patches, (B, Tp, Hp, Wp) = self._patchify(x)
        out2d = _patch_proj(patches, self._w_gemm, self._b_gemm)  # (M, Ep) bf16
        out2d = out2d[:, :self.embed_dim]
        return out2d.reshape(B, Tp, Hp, Wp,
                             self.embed_dim).transpose(0, 4, 1, 2, 3)

    # -- Token layout (B*T', H'*W', E) that VisionMamba.forward consumes ----
    #    Hot path.  With keep_embed_padding=True the 128-wide padded embedding
    #    is returned as-is (pure reshape of the kernel's lane-dense output, no
    #    extra HBM pass); callers can fold the 32-of-128 selection into the
    #    next projection's weight (padded columns are exactly zero).
    def forward_tokens(self, x, keep_embed_padding=False):
        patches, (B, Tp, Hp, Wp) = self._patchify(x)
        out2d = _patch_proj(patches, self._w_gemm, self._b_gemm)
        if not keep_embed_padding:
            out2d = out2d[:, :self.embed_dim]
        return out2d.reshape(B * Tp, Hp * Wp, out2d.shape[-1])


# ---------------------------------------------------------------------------
if __name__ == "__main__":
    key = jax.random.PRNGKey(0)
    xkey, pkey = jax.random.split(key)

    # Small shapes consistent with the module: B=2, C=3, T=2, H=W=16,
    # patch_size=(8,8), kernel_size=1, embed_dim=32.
    B, C, T, H, W = 2, 3, 2, 16, 16
    x = jax.random.normal(xkey, (B, C, T, H, W), dtype=jnp.float32)

    pe = PatchEmbed(width=W, height=H, patch_size=(8, 8),
                    kernel_size=1, in_chans=C, embed_dim=32, key=pkey)

    out = jax.block_until_ready(pe(x))
    assert out.shape == (B, 32, T, H // 8, W // 8), out.shape
    out_f32 = out.astype(jnp.float32)

    # Reference 1: same-precision conv (bf16 operands, f32 accumulation).
    # Our output has one extra bf16 rounding on the store -> slightly looser
    # tolerance than a pure f32-output comparison.
    ref_bf16 = jax.lax.conv_general_dilated(
        x.astype(jnp.bfloat16), pe.weight.astype(jnp.bfloat16),
        window_strides=(pe.kernel_size, *pe.patch_size),
        padding="VALID",
        dimension_numbers=("NCDHW", "OIDHW", "NCDHW"),
        preferred_element_type=jnp.float32,
    ) + pe.bias.reshape(1, -1, 1, 1, 1)
    assert jnp.allclose(out_f32, ref_bf16, atol=1e-2, rtol=1e-2)

    # Reference 2: full-f32 conv (semantics check; loose tol covers bf16 cast).
    ref_f32 = jax.lax.conv_general_dilated(
        x, pe.weight,
        window_strides=(pe.kernel_size, *pe.patch_size),
        padding="VALID",
        dimension_numbers=("NCDHW", "OIDHW", "NCDHW"),
    ) + pe.bias.reshape(1, -1, 1, 1, 1)
    assert jnp.allclose(out_f32, ref_f32, atol=5e-2, rtol=5e-2)

    # Token-layout path used by VisionMamba.forward.
    tok = jax.block_until_ready(pe.forward_tokens(x))
    assert tok.shape == (B * T, (H // 8) * (W // 8), 32), tok.shape

    # Padded (hot-path) token layout: same values, 128-wide lane-dense, with
    # zero columns beyond embed_dim.
    tok_pad = jax.block_until_ready(
        pe.forward_tokens(x, keep_embed_padding=True))
    assert tok_pad.shape == (B * T, (H // 8) * (W // 8), pe.E_pad), tok_pad.shape
    assert jnp.array_equal(tok_pad[..., :32], tok)
    assert jnp.all(tok_pad[..., 32:] == 0)

    print("KERNEL_OK")
</pallas_src>

<mosaic_0001>
module attributes {stable_mosaic.version = 11 : i64} {
  func.func @_patch_proj_kernel(%arg0: i32, %arg1: memref<16x192xbf16, #tpu.memory_space<vmem>>, %arg2: memref<192x128xbf16, #tpu.memory_space<vmem>>, %arg3: memref<1x128xf32, #tpu.memory_space<vmem>>, %arg4: memref<16x128xbf16, #tpu.memory_space<vmem>>) attributes {dimension_semantics = [#tpu.dimension_semantics<parallel>], iteration_bounds = array<i64: 1>, scalar_prefetch = 0 : i64, scratch_operands = 0 : i64, tpu.core_type = #tpu.core_type<tc>, window_params = [{transform_indices = @transform_0, window_bounds = array<i64: 16, 192>}, {pipeline_mode = #tpu.pipeline_mode<synchronous>, transform_indices = @transform_1, window_bounds = array<i64: 192, 128>}, {pipeline_mode = #tpu.pipeline_mode<synchronous>, transform_indices = @transform_2, window_bounds = array<i64: 1, 128>}, {transform_indices = @transform_3, window_bounds = array<i64: 16, 128>}]} {
    %c0 = arith.constant 0 : index
    %c0_0 = arith.constant 0 : index
    %0 = vector.load %arg1[%c0, %c0_0] : memref<16x192xbf16, #tpu.memory_space<vmem>>, vector<16x192xbf16>
    %c0_1 = arith.constant 0 : index
    %c0_2 = arith.constant 0 : index
    %1 = vector.load %arg2[%c0_1, %c0_2] : memref<192x128xbf16, #tpu.memory_space<vmem>>, vector<192x128xbf16>
    %cst = arith.constant dense<0.000000e+00> : vector<16x128xf32>
    %2 = tpu.matmul %0, %1, %cst {dimension_numbers = #tpu.dot_dimension_numbers<[1], [0], [0], [1], [0, 0, 1, 1], [], []>} : vector<16x192xbf16>, vector<192x128xbf16>, vector<16x128xf32> -> vector<16x128xf32>
    %c0_3 = arith.constant 0 : index
    %c0_4 = arith.constant 0 : index
    %3 = vector.load %arg3[%c0_3, %c0_4] : memref<1x128xf32, #tpu.memory_space<vmem>>, vector<1x128xf32>
    %4 = vector.broadcast %3 : vector<1x128xf32> to vector<16x128xf32>
    %5 = arith.addf %2, %4 : vector<16x128xf32>
    %6 = arith.truncf %5 : vector<16x128xf32> to vector<16x128xbf16>
    %c0_5 = arith.constant 0 : index
    %c0_6 = arith.constant 0 : index
    %7 = vector.load %arg4[%c0_5, %c0_6] : memref<16x128xbf16, #tpu.memory_space<vmem>>, vector<16x128xbf16>
    tpu.vector_store %arg4[%c0_5, %c0_6], %6 {strides = array<i32>} : memref<16x128xbf16, #tpu.memory_space<vmem>>, vector<16x128xbf16>,
    return
  }
  func.func @transform_0(%arg0: i32) -> (i32, i32) {
    %c0_i32 = arith.constant 0 : i32
    %c0_i32_0 = arith.constant 0 : i32
    return %arg0, %c0_i32 : i32, i32
  }
  func.func @transform_1(%arg0: i32) -> (i32, i32) {
    %c0_i32 = arith.constant 0 : i32
    %c0_i32_0 = arith.constant 0 : i32
    %c0_i32_1 = arith.constant 0 : i32
    return %c0_i32, %c0_i32_0 : i32, i32
  }
  func.func @transform_2(%arg0: i32) -> (i32, i32) {
    %c0_i32 = arith.constant 0 : i32
    %c0_i32_0 = arith.constant 0 : i32
    %c0_i32_1 = arith.constant 0 : i32
    return %c0_i32, %c0_i32_0 : i32, i32
  }
  func.func @transform_3(%arg0: i32) -> (i32, i32) {
    %c0_i32 = arith.constant 0 : i32
    %c0_i32_0 = arith.constant 0 : i32
    return %arg0, %c0_i32 : i32, i32
  }
}

</mosaic_0001>

<bundles_post_ra>
// kernel: tpu_custom_call.1
= control target key start
LH: loop header
LB: loop body
LE: loop exit
PB: predicated region body
PF: predicated region fallthrough
CT: control target
= control target key end

     0   :  { %8 = vsyncpa [#allocation3], 0  ;;  %s422_s0 = inlined_call_operand.hbm [shape: bf16[16,192], index: 0, kind: input, shape index: {}]   ;;  %s423_s1 = inlined_call_operand.hbm [shape: bf16[192,128], index: 1, kind: input, shape index: {}]   ;;  %s424_s2 = inlined_call_operand.vmem [shape: f32[1,128], index: 2, kind: input, shape index: {}]   ;;  %s425_s3 = inlined_call_operand.hbm [shape: bf16[16,128], index: 3, kind: output, shape index: {}]  }
   0x1   :  { %9 = vsyncpa [#allocation6], 0 }
   0x2   :  { %10 = vsyncpa [#allocation4], 0  ;;  %s15_s14 = sshll.u32 %s422_s0, 4  ;;  %s377_s15 = smov [#allocation2]   ;;  %s16_s14 = int_to_ptr.hbm [resolvable:$true] %s15_s14 }
   0x3   :  { %s17_s16 = sshll.u32 %s377_s15, 4  ;;  %s28_s19 = sshll.u32 %s423_s1, 4  ;;  %s18_s16 = int_to_ptr.vmem [resolvable:$true] %s17_s16  ;;  %s29_s19 = int_to_ptr.hbm [resolvable:$true] %s28_s19 }
   0x4   :  { %s378_s20 = smov 128   ;;  %s379_s21 = smov 8  }
   0x5   :  { %23 = dma.hbm_to_vmem [thread:$0]  %s16_s14, 256, %s18_s16, [#allocation3], %s378_s20, %s378_s20, %s379_s21  }
   0x6   :  { %s380_s22 = smov [#allocation5]   ;;  %s381_s24 = smov 64  }
   0x7   :  { %s30_s23 = sshll.u32 %s380_s22, 4  ;;  %s382_s25 = smov 4   ;;  %s31_s23 = int_to_ptr.vmem [resolvable:$true] %s30_s23 }
   0x8   :  { %36 = dma.hbm_to_vmem [thread:$0]  %s29_s19, 1536, %s31_s23, [#allocation6], %s381_s24, %s381_s24, %s382_s25  }
   0x9   :  { %371 = dma.done.wait [#allocation3], 256  }
   0xa   :  { %372 = vsyncadd [#allocation3], 4294967040 }
   0xb   :  { %373 = dma.done.wait [#allocation6], 1536  }
   0xc   :  { %374 = vsyncadd [#allocation6], 4294965760  ;;  %v281_v0 = vld [vmem:[#allocation5 + $0x38] sm:$0xff]  ;;  %v280_v2 = vld [vmem:[#allocation5 + $0x30] sm:$0xff]  ;;  %vm159_vm0 = vcmask 523264   ;;  %s383_s26 = smov [#allocation7]  }
   0xd   :  { %v285_v1 = vld [vmem:[#allocation5 + $0x58] sm:$0xff]  ;;  %163 = vmatpush.bf16.msra.mxu0 %v281_v0  ;;  %v284_v3 = vld [vmem:[#allocation5 + $0x50] sm:$0xff]  ;;  %v279_v4 = vld [vmem:[#allocation5 + $0x28] sm:$0xff]  ;;  %s199_s27 = sshll.u32 %s383_s26, 4  ;;  %s201_s30 = sshll.u32 %s425_s3, 4  ;;  %s200_s27 = int_to_ptr.vmem [resolvable:$true] %s199_s27  ;;  %s202_s30 = int_to_ptr.hbm [resolvable:$true] %s201_s30 }
   0xe   :  { %181 = vmatpush.bf16.msra.mxu1 %v285_v1  ;;  %v283_v5 = vld [vmem:[#allocation5 + $0x48] sm:$0xff]  ;;  %v278_v6 = vld [vmem:[#allocation5 + $0x20] sm:$0xff]  ;;  %v272_v8 = vld [vmem:[#allocation2 + $0x4] sm:$0xf] }
   0xf   :  { %v282_v7 = vld [vmem:[#allocation5 + $0x40] sm:$0xff]  ;;  %v219_v9 = vld [vmem:[#allocation2 + $0x8] sm:$0xf0]  ;;  %v276_v12 = vld [vmem:[#allocation5 + $0x10] sm:$0xff] }
  0x10   :  { %v277_v10 = vld [vmem:[#allocation5 + $0x18] sm:$0xff]  ;;  %v222_v11 = vor.u32 %v272_v8, %v219_v9  ;;  %v275_v13 = vld [vmem:[#allocation5 + $0x8] sm:$0xff]  ;;  %v274_v14 = vld [vmem:[#allocation5] sm:$0xff] }
  0x11   :  { %164 = vmatpush.bf16.msra.mxu0 %v280_v2  ;;  %v217_v15 = vld [vmem:[#allocation2] sm:$0xf]  ;;  %v273_v16 = vld [vmem:[#allocation2 + $0x4] sm:$0xf0] }
  0x12   :  { %182 = vmatpush.bf16.msra.mxu1 %v284_v3  ;;  %v218_v17 = vor.u32 %v273_v16, %v217_v15  ;;  %v298_v20 = vld [vmem:[%s424_s2] ss:$0 sm:$0xff] }
  0x15   :  { %165 = vmatpush.bf16.msra.mxu0 %v279_v4 }
  0x16   :  { %183 = vmatpush.bf16.msra.mxu1 %v283_v5 }
  0x19   :  { %166 = vmatpush.bf16.msra.mxu0 %v278_v6 }
  0x1a   :  { %184 = vmatpush.bf16.msra.mxu1 %v282_v7 }
  0x1d   :  { %167 = vmatpush.bf16.msra.mxu0 %v277_v10  ;;  %271 = vmatmul.msk.bf16.vlgmr.msra.gmra.mxu1 %vm159_vm0, %v222_v11 }
  0x21   :  { %168 = vmatpush.bf16.msra.mxu0 %v276_v12 }
  0x25   :  { %169 = vmatpush.bf16.msra.mxu0 %v275_v13 }
  0x29   :  { %170 = vmatpush.bf16.msra.mxu0 %v274_v14 }
  0x2c   :  { %171 = vmatmul.bf16.vlgmr.msra.gmra.mxu0 %v218_v17 }
  0x9a   :  { %v186_v18 = vpop.f32.mrf.mxu1 }
  0xa2   :  { %v188_v24 = vpop.f32.mrf.mxu1 }
  0xa9   :  { %v172_v19 = vpop.f32.mrf.mxu0 }
  0xaa   :  { %v173_v21 = vadd.f32 %v298_v20, %v172_v19 }
  0xac   :  { %v187_v25 = vadd.f32 %v186_v18, %v173_v21 }
  0xb1   :  { %v174_v22 = vpop.f32.mrf.mxu0 }
  0xb2   :  { %v175_v23 = vadd.f32 %v298_v20, %v174_v22 }
  0xb4   :  { %v189_v26 = vadd.f32 %v188_v24, %v175_v23 }
  0xb6   :  { %v289_v27 = vpack.c.bf16 %v189_v26, %v187_v25 }
  0xb8   :  { %290 = vst [vmem:[#allocation7] sm:$0xff] %v289_v27  }
  0xb9   :  { %207 = dma.vmem_to_hbm [thread:$0]  %s200_s27, 128, %s202_s30, [#allocation4], %s381_s24, %s381_s24, %s382_s25  }
  0xba   :  { %375 = dma.done.wait [#allocation4], 128  }
  0xbb   :  { %376 = vsyncadd [#allocation4], 4294967168 }
  0xbc   :  { %212 = vsyncpa [#allocation3], 1 }
  0xbd   :  { %213 = vsyncpa [#allocation6], 1 }
  0xbe   :  { %214 = vsyncpa [#allocation4], 1 }

</bundles_post_ra>
